<compile_context>
chip_gen: v5e
topology: v5e:2x2
jax: 0.10.0
libtpu: 0.0.40
codegen_flags: <defaults>
</compile_context>

<pallas_src>
import functools

import jax
import jax.numpy as jnp
from jax.experimental import pallas as pl
from jax.experimental.pallas import tpu as pltpu

_LN_EPS = 1e-5  # torch.nn.LayerNorm default


# ----------------------------- in-kernel helpers -----------------------------

def _layernorm(x, gamma, beta):
    mean = jnp.mean(x, axis=-1, keepdims=True)
    var = jnp.mean(jnp.square(x - mean), axis=-1, keepdims=True)
    return (x - mean) * jax.lax.rsqrt(var + _LN_EPS) * gamma + beta


def _gelu(x):
    # TODO(synk): PyTorch nn.GELU default is the exact erf form; the tanh
    # approximation is used to guarantee Mosaic lowering of the transcendental.
    c = 0.7978845608028654  # sqrt(2/pi)
    return 0.5 * x * (1.0 + jnp.tanh(c * (x + 0.044715 * x * x * x)))


# ------------------------------- Pallas kernels ------------------------------

def embed_kernel(p_ref, w_ref, b_ref, cls_ref, pos_ref, o_ref):
    """Patch projection fused with bias + cls concat + positional embedding."""
    tok = (
        jnp.dot(p_ref[0].astype(jnp.bfloat16), w_ref[...],
                preferred_element_type=jnp.float32)
        + b_ref[...]
    )                                                        # (N, D) f32
    full = jnp.concatenate([cls_ref[0], tok], axis=0)        # (N + 1, D)
    o_ref[0] = full + pos_ref[0]


def encoder_stack_kernel(
    x_ref, ln1g, ln1b, wqkv, bqkv, wo, bo, ln2g, ln2b, w1, b1, w2, b2,
    o_ref, *, num_heads,
):
    """Whole transformer encoder.  Grid axis 0 = depth (sequential carry).

    The token activations live in the VMEM-resident output block across all
    layers; per-layer weights are streamed via BlockSpec index maps (pipelined
    against the previous layer's compute).  Activations are tokens-major:
    x is (T, L, D) with T = tokens, L = image batch; attention runs over L."""
    @pl.when(pl.program_id(0) == 0)
    def _():
        o_ref[...] = x_ref[...]

    x = o_ref[...]                                           # (T, L, D) f32
    T, L, D = x.shape
    hd = D // num_heads
    scale = 1.0 / float(hd) ** 0.5

    # ---- pre-norm + fused-QKV multi-head self-attention ---------------------
    xn = _layernorm(x, ln1g[0], ln1b[0])
    x2 = xn.reshape(T * L, D).astype(jnp.bfloat16)
    qkv = jnp.dot(x2, wqkv[0], preferred_element_type=jnp.float32) + bqkv[0]

    ctx_heads = []
    for h in range(num_heads):                               # unrolled at trace time
        qh = (qkv[:, h * hd:(h + 1) * hd] * scale).reshape(T, L, hd)
        kh = qkv[:, D + h * hd:D + (h + 1) * hd].reshape(T, L, hd)
        vh = qkv[:, 2 * D + h * hd:2 * D + (h + 1) * hd].reshape(T, L, hd)
        # Batched MXU matmuls; the batch dim (= tokens) is leading.
        s = jnp.einsum("nld,nmd->nlm",
                       qh.astype(jnp.bfloat16), kh.astype(jnp.bfloat16),
                       preferred_element_type=jnp.float32)   # (T, L, L)
        s = s - jnp.max(s, axis=-1, keepdims=True)
        p = jnp.exp(s)
        p = p * pl.reciprocal(jnp.sum(p, axis=-1, keepdims=True), approx=True)
        c = jnp.einsum("nlm,nmd->nld",
                       p.astype(jnp.bfloat16), vh.astype(jnp.bfloat16),
                       preferred_element_type=jnp.float32)   # (T, L, hd)
        ctx_heads.append(c.reshape(T * L, hd))
    ctx = jnp.concatenate(ctx_heads, axis=-1)                # (T*L, D)

    attn = (
        jnp.dot(ctx.astype(jnp.bfloat16), wo[0], preferred_element_type=jnp.float32)
        + bo[0]
    )
    x_attn = attn.reshape(T, L, D) + x

    # ---- post-norm + MLP (hidden zero-padded to 128 lanes; exact: gelu(0)=0) -
    xn2 = _layernorm(x_attn, ln2g[0], ln2b[0])
    h1 = (
        jnp.dot(xn2.reshape(T * L, D).astype(jnp.bfloat16), w1[0],
                preferred_element_type=jnp.float32)
        + b1[0]
    )
    h1 = _gelu(h1)
    m = (
        jnp.dot(h1.astype(jnp.bfloat16), w2[0], preferred_element_type=jnp.float32)
        + b2[0]
    )
    o_ref[...] = m.reshape(T, L, D) + x_attn


def head_kernel(x_ref, g_ref, b_ref, w_ref, bias_ref, o_ref):
    """mlp_head: LayerNorm + Linear on the cls token (class dim padded to 128)."""
    xn = _layernorm(x_ref[...], g_ref[...], b_ref[...])
    o_ref[...] = (
        jnp.dot(xn.astype(jnp.bfloat16), w_ref[...], preferred_element_type=jnp.float32)
        + bias_ref[...]
    )


# ------------------------------ Python wrappers -------------------------------

def patchify(x, ph, pw):
    """Exactly mirrors unfold/unfold/permute/flatten of the reference."""
    B, C, H, W = x.shape
    gh, gw = H // ph, W // pw
    x = x.reshape(B, C, gh, ph, gw, pw)
    x = x.transpose(0, 2, 4, 3, 5, 1)             # (B, gh, gw, ph, pw, C)
    return x.reshape(B, gh * gw, ph * pw * C)


def embed(patches, w, b, cls_token, pos_embedding):
    B, N, Pd = patches.shape
    D = w.shape[1]
    cost = pl.CostEstimate(
        flops=int(2 * B * N * Pd * D),
        transcendentals=0,
        bytes_accessed=int(patches.nbytes + w.nbytes + b.nbytes + cls_token.nbytes
                           + pos_embedding.nbytes + B * (N + 1) * D * 4),
    )
    return pl.pallas_call(
        embed_kernel,
        out_shape=jax.ShapeDtypeStruct((B, N + 1, D), jnp.float32),
        grid=(B,),
        in_specs=[
            pl.BlockSpec((1, N, Pd), lambda i: (i, 0, 0)),
            pl.BlockSpec((Pd, D), lambda i: (0, 0)),
            pl.BlockSpec((1, D), lambda i: (0, 0)),
            pl.BlockSpec((1, 1, D), lambda i: (0, 0, 0)),
            pl.BlockSpec((1, N + 1, D), lambda i: (0, 0, 0)),
        ],
        out_specs=pl.BlockSpec((1, N + 1, D), lambda i: (i, 0, 0)),
        compiler_params=pltpu.CompilerParams(dimension_semantics=("parallel",)),
        cost_estimate=cost,
    )(patches, w, b, cls_token, pos_embedding)


def transformer_encoder(x_tld, stacked, num_heads):
    T, L, D = x_tld.shape
    depth = stacked["wqkv"].shape[0]
    mlp_pad = stacked["w1"].shape[-1]
    hd = D // num_heads

    flops_layer = (2 * T * L * (D * 3 * D + D * D + 2 * D * mlp_pad)
                   + 4 * num_heads * T * L * L * hd)
    trans_layer = num_heads * T * L * L + T * L * mlp_pad
    cost = pl.CostEstimate(
        flops=int(depth * flops_layer),
        transcendentals=int(depth * trans_layer),
        bytes_accessed=int(2 * x_tld.nbytes + sum(v.nbytes for v in stacked.values())),
    )

    tok_map = lambda d: (0, 0, 0)      # noqa: E731
    layer_map = lambda d: (d, 0, 0)    # noqa: E731

    in_specs = [
        pl.BlockSpec((T, L, D), tok_map),            # x (only read at step 0)
        pl.BlockSpec((1, 1, D), layer_map),          # ln1_g
        pl.BlockSpec((1, 1, D), layer_map),          # ln1_b
        pl.BlockSpec((1, D, 3 * D), layer_map),      # wqkv (bf16)
        pl.BlockSpec((1, 1, 3 * D), layer_map),      # bqkv
        pl.BlockSpec((1, D, D), layer_map),          # wo (bf16)
        pl.BlockSpec((1, 1, D), layer_map),          # bo
        pl.BlockSpec((1, 1, D), layer_map),          # ln2_g
        pl.BlockSpec((1, 1, D), layer_map),          # ln2_b
        pl.BlockSpec((1, D, mlp_pad), layer_map),    # w1 (bf16, padded)
        pl.BlockSpec((1, 1, mlp_pad), layer_map),    # b1 (padded)
        pl.BlockSpec((1, mlp_pad, D), layer_map),    # w2 (bf16, padded)
        pl.BlockSpec((1, 1, D), layer_map),          # b2
    ]
    # TODO(synk): at production ViT sizes (D=768, MLP=3072, 197 tokens) the token
    # and MLP axes should additionally be tiled to fit v7x's 64 MiB VMEM.
    return pl.pallas_call(
        functools.partial(encoder_stack_kernel, num_heads=num_heads),
        out_shape=jax.ShapeDtypeStruct((T, L, D), jnp.float32),
        grid=(depth,),
        in_specs=in_specs,
        out_specs=pl.BlockSpec((T, L, D), tok_map),
        compiler_params=pltpu.CompilerParams(dimension_semantics=("arbitrary",)),
        cost_estimate=cost,
    )(x_tld, stacked["ln1_g"], stacked["ln1_b"], stacked["wqkv"], stacked["bqkv"],
      stacked["wo"], stacked["bo"], stacked["ln2_g"], stacked["ln2_b"],
      stacked["w1"], stacked["b1"], stacked["w2"], stacked["b2"])


def mlp_head(cls_tok, g, b, w_pad, bias_pad, num_classes):
    B, _ = cls_tok.shape
    ncp = w_pad.shape[1]
    vmem = pl.BlockSpec(memory_space=pltpu.MemorySpace.VMEM)
    logits = pl.pallas_call(
        head_kernel,
        out_shape=jax.ShapeDtypeStruct((B, ncp), jnp.float32),
        in_specs=[vmem] * 5,
        out_specs=vmem,
    )(cls_tok, g, b, w_pad, bias_pad)
    return logits[:, :num_classes]


def vit_forward(x_nchw, params, cfg):
    patches = patchify(x_nchw, cfg["ph"], cfg["pw"])                 # (B, N, patch_dim)
    tok = embed(patches, params["proj_w"], params["proj_b"],
                params["cls_token"], params["pos_embedding"])        # (B, N+1, D)
    x_tld = jnp.transpose(tok, (1, 0, 2))                            # (N+1, B, D)
    x_tld = transformer_encoder(x_tld, params["stacked"], cfg["num_heads"])
    cls_out = x_tld[0]                                               # (B, D)
    return mlp_head(cls_out, params["head_ln_g"], params["head_ln_b"],
                    params["head_w"], params["head_b"], cfg["num_classes"])


# ------------------------------ parameter setup -------------------------------

def init_params(key, cfg):
    D, MLP = cfg["hidden_dim"], cfg["mlp_size"]
    NC, PD, NP = cfg["num_classes"], cfg["patch_dim"], cfg["patch_count"]
    depth, mlp_pad, nc_pad = cfg["depth"], cfg["mlp_pad"], cfg["nc_pad"]
    keys = iter(jax.random.split(key, 8 * depth + 8))

    def w(shape, scale=0.02):
        return (scale * jax.random.normal(next(keys), shape)).astype(jnp.float32)

    layers = []
    for _ in range(depth):
        layers.append({
            "ln1_g": jnp.ones((1, D), jnp.float32),
            "ln1_b": jnp.zeros((1, D), jnp.float32),
            "wq": w((D, D)), "wk": w((D, D)), "wv": w((D, D)),
            "bq": jnp.zeros((1, D), jnp.float32),
            "bk": jnp.zeros((1, D), jnp.float32),
            "bv": jnp.zeros((1, D), jnp.float32),
            "wo": w((D, D)), "bo": jnp.zeros((1, D), jnp.float32),
            "ln2_g": jnp.ones((1, D), jnp.float32),
            "ln2_b": jnp.zeros((1, D), jnp.float32),
            "w1": w((D, MLP)), "b1": jnp.zeros((1, MLP), jnp.float32),
            "w2": w((MLP, D)), "b2": jnp.zeros((1, D), jnp.float32),
        })

    def stack(fn):
        return jnp.stack([fn(l) for l in layers], axis=0)

    stacked = {
        # fused QKV projection (bf16 weights for the MXU, f32 biases)
        "wqkv": stack(lambda l: jnp.concatenate([l["wq"], l["wk"], l["wv"]], axis=1)
                      ).astype(jnp.bfloat16),
        "bqkv": stack(lambda l: jnp.concatenate([l["bq"], l["bk"], l["bv"]], axis=1)),
        "wo": stack(lambda l: l["wo"]).astype(jnp.bfloat16),
        "bo": stack(lambda l: l["bo"]),
        "ln1_g": stack(lambda l: l["ln1_g"]),
        "ln1_b": stack(lambda l: l["ln1_b"]),
        "ln2_g": stack(lambda l: l["ln2_g"]),
        "ln2_b": stack(lambda l: l["ln2_b"]),
        # MLP hidden zero-padded to a lane-dense width (exact: gelu(0) == 0)
        "w1": stack(lambda l: jnp.pad(l["w1"], ((0, 0), (0, mlp_pad - MLP)))
                    ).astype(jnp.bfloat16),
        "b1": stack(lambda l: jnp.pad(l["b1"], ((0, 0), (0, mlp_pad - MLP)))),
        "w2": stack(lambda l: jnp.pad(l["w2"], ((0, mlp_pad - MLP), (0, 0)))
                    ).astype(jnp.bfloat16),
        "b2": stack(lambda l: l["b2"]),
    }

    params = {
        "proj_w": w((PD, D)).astype(jnp.bfloat16),
        "proj_b": jnp.zeros((1, D), jnp.float32),
        "cls_token": jax.random.uniform(next(keys), (1, 1, D), jnp.float32),
        "pos_embedding": jax.random.uniform(next(keys), (1, NP + 1, D), jnp.float32),
        "head_ln_g": jnp.ones((1, D), jnp.float32),
        "head_ln_b": jnp.zeros((1, D), jnp.float32),
        # head weight zero-padded on the class axis to a lane-dense 128; sliced after
        "head_w": jnp.pad(w((D, NC)), ((0, 0), (0, nc_pad - NC))).astype(jnp.bfloat16),
        "head_b": jnp.zeros((1, nc_pad), jnp.float32),
        "stacked": stacked,
    }
    return params


# ------------------------------------ main -------------------------------------

if __name__ == "__main__":
    cfg = dict(
        num_classes=10,
        in_channels=4,
        ph=8, pw=8,               # patch size
        hidden_dim=32,
        mlp_size=64,
        num_heads=4,
        depth=2,
    )
    H = W = 16
    cfg["patch_count"] = (H // cfg["ph"]) * (W // cfg["pw"])           # 4
    cfg["patch_dim"] = cfg["in_channels"] * cfg["ph"] * cfg["pw"]      # 256
    cfg["mlp_pad"] = max(128, -(-cfg["mlp_size"] // 128) * 128)        # 128
    cfg["nc_pad"] = max(128, -(-cfg["num_classes"] // 128) * 128)      # 128

    key = jax.random.PRNGKey(0)
    k_x, k_p = jax.random.split(key)
    x = jax.random.normal(k_x, (2, cfg["in_channels"], H, W), dtype=jnp.float32)
    params = init_params(k_p, cfg)

    y = vit_forward(x, params, cfg)
    y = jax.block_until_ready(y)
    assert y.shape == (2, cfg["num_classes"]), y.shape
    assert bool(jnp.all(jnp.isfinite(y)))
    print("KERNEL_OK")
</pallas_src>

<mosaic_0001>
module attributes {stable_mosaic.version = 11 : i64} {
  func.func @embed_kernel(%arg0: i32, %arg1: memref<1x4x256xf32, #tpu.memory_space<vmem>>, %arg2: memref<256x32xbf16, #tpu.memory_space<vmem>>, %arg3: memref<1x32xf32, #tpu.memory_space<vmem>>, %arg4: memref<1x1x32xf32, #tpu.memory_space<vmem>>, %arg5: memref<1x5x32xf32, #tpu.memory_space<vmem>>, %arg6: memref<1x5x32xf32, #tpu.memory_space<vmem>>) attributes {dimension_semantics = [#tpu.dimension_semantics<parallel>], iteration_bounds = array<i64: 2>, scalar_prefetch = 0 : i64, scratch_operands = 0 : i64, tpu.core_type = #tpu.core_type<tc>, window_params = [{transform_indices = @transform_0, window_bounds = array<i64: 1, 4, 256>}, {pipeline_mode = #tpu.pipeline_mode<synchronous>, transform_indices = @transform_1, window_bounds = array<i64: 256, 32>}, {pipeline_mode = #tpu.pipeline_mode<synchronous>, transform_indices = @transform_2, window_bounds = array<i64: 1, 32>}, {pipeline_mode = #tpu.pipeline_mode<synchronous>, transform_indices = @transform_3, window_bounds = array<i64: 1, 1, 32>}, {pipeline_mode = #tpu.pipeline_mode<synchronous>, transform_indices = @transform_4, window_bounds = array<i64: 1, 5, 32>}, {transform_indices = @transform_5, window_bounds = array<i64: 1, 5, 32>}]} {
    %c0 = arith.constant 0 : index
    %c0_0 = arith.constant 0 : index
    %c0_1 = arith.constant 0 : index
    %0 = vector.load %arg1[%c0, %c0_0, %c0_1] : memref<1x4x256xf32, #tpu.memory_space<vmem>>, vector<1x4x256xf32>
    %1 = vector.shape_cast %0 : vector<1x4x256xf32> to vector<4x256xf32>
    %2 = arith.truncf %1 : vector<4x256xf32> to vector<4x256xbf16>
    %c0_2 = arith.constant 0 : index
    %c0_3 = arith.constant 0 : index
    %3 = vector.load %arg2[%c0_2, %c0_3] : memref<256x32xbf16, #tpu.memory_space<vmem>>, vector<256x32xbf16>
    %cst = arith.constant dense<0.000000e+00> : vector<4x32xf32>
    %4 = tpu.matmul %2, %3, %cst {dimension_numbers = #tpu.dot_dimension_numbers<[1], [0], [0], [1], [0, 0, 1, 1], [], []>} : vector<4x256xbf16>, vector<256x32xbf16>, vector<4x32xf32> -> vector<4x32xf32>
    %c0_4 = arith.constant 0 : index
    %c0_5 = arith.constant 0 : index
    %5 = vector.load %arg3[%c0_4, %c0_5] : memref<1x32xf32, #tpu.memory_space<vmem>>, vector<1x32xf32>
    %6 = vector.broadcast %5 : vector<1x32xf32> to vector<4x32xf32>
    %7 = arith.addf %4, %6 : vector<4x32xf32>
    %c0_6 = arith.constant 0 : index
    %c0_7 = arith.constant 0 : index
    %c0_8 = arith.constant 0 : index
    %8 = vector.load %arg4[%c0_6, %c0_7, %c0_8] : memref<1x1x32xf32, #tpu.memory_space<vmem>>, vector<1x1x32xf32>
    %9 = vector.shape_cast %8 : vector<1x1x32xf32> to vector<1x32xf32>
    %10 = tpu.concatenate %9, %7 in 0 : vector<1x32xf32>, vector<4x32xf32> -> vector<5x32xf32>
    %c0_9 = arith.constant 0 : index
    %c0_10 = arith.constant 0 : index
    %c0_11 = arith.constant 0 : index
    %11 = vector.load %arg5[%c0_9, %c0_10, %c0_11] : memref<1x5x32xf32, #tpu.memory_space<vmem>>, vector<1x5x32xf32>
    %12 = vector.shape_cast %11 : vector<1x5x32xf32> to vector<5x32xf32>
    %13 = arith.addf %10, %12 : vector<5x32xf32>
    %c0_12 = arith.constant 0 : index
    %c0_13 = arith.constant 0 : index
    %c0_14 = arith.constant 0 : index
    %14 = vector.load %arg6[%c0_12, %c0_13, %c0_14] : memref<1x5x32xf32, #tpu.memory_space<vmem>>, vector<1x5x32xf32>
    %15 = vector.shape_cast %14 : vector<1x5x32xf32> to vector<5x32xf32>
    %16 = vector.shape_cast %13 : vector<5x32xf32> to vector<1x5x32xf32>
    tpu.vector_store %arg6[%c0_12, %c0_13, %c0_14], %16 {strides = array<i32>} : memref<1x5x32xf32, #tpu.memory_space<vmem>>, vector<1x5x32xf32>,
    return
  }
  func.func @transform_0(%arg0: i32) -> (i32, i32, i32) {
    %c0_i32 = arith.constant 0 : i32
    %c0_i32_0 = arith.constant 0 : i32
    %c0_i32_1 = arith.constant 0 : i32
    return %arg0, %c0_i32, %c0_i32_0 : i32, i32, i32
  }
  func.func @transform_1(%arg0: i32) -> (i32, i32) {
    %c0_i32 = arith.constant 0 : i32
    %c0_i32_0 = arith.constant 0 : i32
    %c0_i32_1 = arith.constant 0 : i32
    return %c0_i32, %c0_i32_0 : i32, i32
  }
  func.func @transform_2(%arg0: i32) -> (i32, i32) {
    %c0_i32 = arith.constant 0 : i32
    %c0_i32_0 = arith.constant 0 : i32
    %c0_i32_1 = arith.constant 0 : i32
    return %c0_i32, %c0_i32_0 : i32, i32
  }
  func.func @transform_3(%arg0: i32) -> (i32, i32, i32) {
    %c0_i32 = arith.constant 0 : i32
    %c0_i32_0 = arith.constant 0 : i32
    %c0_i32_1 = arith.constant 0 : i32
    %c0_i32_2 = arith.constant 0 : i32
    return %c0_i32, %c0_i32_0, %c0_i32_1 : i32, i32, i32
  }
  func.func @transform_4(%arg0: i32) -> (i32, i32, i32) {
    %c0_i32 = arith.constant 0 : i32
    %c0_i32_0 = arith.constant 0 : i32
    %c0_i32_1 = arith.constant 0 : i32
    %c0_i32_2 = arith.constant 0 : i32
    return %c0_i32, %c0_i32_0, %c0_i32_1 : i32, i32, i32
  }
  func.func @transform_5(%arg0: i32) -> (i32, i32, i32) {
    %c0_i32 = arith.constant 0 : i32
    %c0_i32_0 = arith.constant 0 : i32
    %c0_i32_1 = arith.constant 0 : i32
    return %arg0, %c0_i32, %c0_i32_0 : i32, i32, i32
  }
}

</mosaic_0001>

<bundles_post_ra>
// kernel: tpu_custom_call.1
= control target key start
LH: loop header
LB: loop body
LE: loop exit
PB: predicated region body
PF: predicated region fallthrough
CT: control target
= control target key end

     0   :  { %s591_s18 = smov 0   ;;  %s672_s0 = inlined_call_operand.vmem [shape: f32[2,4,256], index: 0, kind: input, shape index: {}]   ;;  %s673_s1 = inlined_call_operand.vmem [shape: bf16[256,32], index: 1, kind: input, shape index: {}]   ;;  %s674_s2 = inlined_call_operand.vmem [shape: f32[1,32], index: 2, kind: input, shape index: {}]   ;;  %s675_s3 = inlined_call_operand.vmem [shape: f32[1,1,32], index: 3, kind: input, shape index: {}]   ;;  %s676_s4 = inlined_call_operand.vmem [shape: f32[1,5,32], index: 4, kind: input, shape index: {}]   ;;  %s677_s5 = inlined_call_operand.vmem [shape: f32[2,5,32], index: 5, kind: output, shape index: {}]  }
   0x1 LB: > { %s453_s19 = sadd.s32 4294967295, %s559_s18   ;;  %p457_p0 = scmp.ge.s32.totalorder %s559_s18, 1  ;;  %s559_s18 = sphi %s591_s18, %s15_s18  }
   0x2   : > { %p187_p1 = scmp.lt.s32.totalorder %s559_s18, 3 }
   0x4   : > { %p188_p2 = pnand %p457_p0, %p187_p1 }
   0x5   : > { %p214_p3 = scmp.lt.s32.totalorder (!%p188_p2), %s453_s19, 1 }
   0x6   : > { %191 = sbr.rel (%p188_p2) target bundleno = 179 (0xb3), region = 40 }
   0xb   : > { %v535_v0 = vld [vmem:[%s673_s1 + $0x38] sm:$0xff]  ;;  %v534_v2 = vld [vmem:[%s673_s1 + $0x30] sm:$0xff]  ;;  %s679_s19 = smov (!%p214_p3, %s453_s19), 1  ;;  %v533_v4 = vld [vmem:[%s673_s1 + $0x28] sm:$0xff]  ;;  %vm394_vm0 = vcmask 1040384   ;;  %vm398_vm1 = vcmask 258048  }
   0xc   : > { %v543_v1 = vld [vmem:[%s673_s1 + $0x78] sm:$0xff]  ;;  %364 = vmatpush.bf16.msra.mxu0 %v535_v0  ;;  %v542_v3 = vld [vmem:[%s673_s1 + $0x70] sm:$0xff]  ;;  %s527_s28 = sshll.u32 %s679_s19, 3  ;;  %v541_v5 = vld [vmem:[%s673_s1 + $0x68] sm:$0xff] }
   0xd   : > { %377 = vmatpush.bf16.msra.mxu1 %v543_v1  ;;  %s218_s6 = scalar_lea.vmem %s672_s0, %s527_s28  ;;  %v532_v7 = vld [vmem:[%s673_s1 + $0x20] sm:$0xff]  ;;  %v531_v9 = vld [vmem:[%s673_s1 + $0x18] sm:$0xff]  ;;  %v530_v11 = vld [vmem:[%s673_s1 + $0x10] sm:$0xff]  ;;  %s222_s17 = scalar_lea.vmem %s677_s5, %s527_s28 }
   0xe   : > { %v223_v6 = vld [vmem:[%s218_s6] sm:$0xff]  ;;  %v539_v10 = vld [vmem:[%s673_s1 + $0x58] sm:$0xff]  ;;  %v538_v12 = vld [vmem:[%s673_s1 + $0x50] sm:$0xff] }
   0xf   : > { %225 = vst [vmem:[#allocation1] ss:$2 sm:$0xff] %v223_v6  ;;  %v540_v8 = vld [vmem:[%s673_s1 + $0x60] sm:$0xff]  ;;  %v529_v13 = vld [vmem:[%s673_s1 + $0x8] sm:$0xff] }
  0x10   : > { %365 = vmatpush.bf16.msra.mxu0 %v534_v2  ;;  %v537_v14 = vld [vmem:[%s673_s1 + $0x48] sm:$0xff]  ;;  %v528_v15 = vld [vmem:[%s673_s1] sm:$0xff] }
  0x11   : > { %378 = vmatpush.bf16.msra.mxu1 %v542_v3  ;;  %v536_v16 = vld [vmem:[%s673_s1 + $0x40] sm:$0xff] }
  0x12   : > { %v552_v21 = vld [vmem:[%s674_s2] ss:$0 sm:$0xff] }
  0x13   : > { %v390_v26 = vld [vmem:[%s675_s3] sm:$0x1] }
  0x14   : > { %366 = vmatpush.bf16.msra.mxu0 %v533_v4  ;;  %v396_v28 = vld [vmem:[%s676_s4] sm:$0x1f] }
  0x15   : > { %379 = vmatpush.bf16.msra.mxu1 %v541_v5 }
  0x16   : > { %v226_v17 = vld.sshfl [vmem:[#allocation1] sm:$0xff pattern:$0x75316420]  ;;  %v227_v18 = vld.sshfl [vmem:[#allocation1 + $0x8] sm:$0xff pattern:$0x75316420] }
  0x17   : > { %v230_v19 = vpack.c.bf16 %v226_v17, %v226_v17  ;;  %v231_v20 = vpack.c.bf16 %v227_v18, %v227_v18 }
  0x18   : > { %367 = vmatpush.bf16.msra.mxu0 %v532_v7 }
  0x19   : > { %380 = vmatpush.bf16.msra.mxu1 %v540_v8 }
  0x1c   : > { %368 = vmatpush.bf16.msra.mxu0 %v531_v9 }
  0x1d   : > { %381 = vmatpush.bf16.msra.mxu1 %v539_v10 }
  0x20   : > { %369 = vmatpush.bf16.msra.mxu0 %v530_v11 }
  0x21   : > { %382 = vmatpush.bf16.msra.mxu1 %v538_v12 }
  0x24   : > { %370 = vmatpush.bf16.msra.mxu0 %v529_v13 }
  0x25   : > { %383 = vmatpush.bf16.msra.mxu1 %v537_v14 }
  0x28   : > { %371 = vmatpush.bf16.msra.mxu0 %v528_v15 }
  0x29   : > { %384 = vmatpush.bf16.msra.mxu1 %v536_v16 }
  0x2b   : > { %372 = vmatmul.bf16.vlgmr.msra.gmra.mxu0 %v230_v19 }
  0x2c   : > { %385 = vmatmul.bf16.vlgmr.msra.gmra.mxu1 %v231_v20 }
  0xa8   : > { %v373_v22 = vpop.f32.mrf.mxu0 }
  0xa9   : > { %v386_v23 = vpop.f32.mrf.mxu1  ;;  %v374_v24 = vadd.f32 %v552_v21, %v373_v22 }
  0xab   : > { %v387_v25 = vadd.f32 %v386_v23, %v374_v24 }
  0xad   : > { %v392_v27 = vrot.slane %v387_v25, 7 }
  0xaf   : > { %v395_v29 = vsel %vm394_vm0, %v390_v26, %v392_v27 }
  0xb0   : > { %v397_v30 = vadd.f32 %v396_v28, %v395_v29  ;;  %v375_v31 = vpop.f32.mrf.mxu0 }
  0xb1   : > { %v388_v32 = vpop.f32.mrf.mxu1 }
  0xb2   : > { %399 = vst.msk [vmem:[%s222_s17] sm:$0x1f] %vm398_vm1, %v397_v30 }
  0xb3 PF: > { %s15_s18 = sadd.s32 1, %s559_s18  }
  0xb4   : > { %p12_p4 = scmp.ge.s32.totalorder %s15_s18, 4  }
  0xb6   :  { %14 = sbr.rel (!%p12_p4) target bundleno = 1 (0x1), region = 70 }

</bundles_post_ra>
